<compile_context>
chip_gen: v7x
topology: tpu7x:2x2x1
jax: 0.10.0
libtpu: 0.0.40
codegen_flags: <defaults>
</compile_context>

<pallas_src>
import functools
import math

import jax
import jax.numpy as jnp
from jax.experimental import pallas as pl
from jax.experimental.pallas import tpu as pltpu


_TARGET_BLOCK_BYTES = 4 * 1024 * 1024   # ~4 MiB x blocks (past the roofline knee)


def _add_pe_fused_kernel(x_ref, pe_ref, o_ref, *, n_batch, d_model):
    """x_ref / o_ref: (tS, n_batch*d_model) lane-dense tiles; pe_ref: (tS, d_model).

    Batch is fused into the lane axis so every (8,128) vreg tile is fully used even
    for tiny batch sizes; pe is broadcast across the batch column groups with static
    slices (no reshape/concat lowering needed).
    """
    pe = pe_ref[...]
    for b in range(n_batch):
        lo = b * d_model
        o_ref[:, lo:lo + d_model] = x_ref[:, lo:lo + d_model] + pe


def _add_pe_3d_kernel(x_ref, pe_ref, o_ref):
    """x_ref / o_ref: (tS, tB, D); pe_ref: (tS, D). Used when B is sublane-dense."""
    o_ref[...] = x_ref[...] + pe_ref[...][:, None, :]


def _round_down8(n):
    return (n // 8) * 8


def _round_up8(n):
    return ((n + 7) // 8) * 8


def _pick_seq_tile(S, row_bytes, target=_TARGET_BLOCK_BYTES):
    """Seq tile: ~target bytes per x block, multiple of 8 whenever it splits S,
    and at least two tiles when S allows it (v7x megacore balance)."""
    tS = max(1, target // max(1, row_bytes))
    if tS < S:
        tS = max(8, _round_down8(tS))
    tS = min(tS, S)
    if tS >= S and S > 8:            # a single tile would idle one v7x TensorCore
        tS = max(8, _round_up8(-(-S // 2)))
    return tS


class PositionalEncodingPallas:
    """JAX/Pallas equivalent of the PyTorch PositionalEncoding module (dropout p=0)."""

    def __init__(self, d_model, dropout=0.0, max_len=5000):
        assert dropout == 0.0  # nn.Dropout(p=0.0) is the identity
        # TODO(synk): nonzero dropout needs pltpu.prng_seed / prng_random_bits masking.
        self.d_model = d_model
        self.max_len = max_len
        position = jnp.arange(0, max_len, dtype=jnp.float32)[:, None]            # (max_len, 1)
        div_term = jnp.exp(jnp.arange(0, d_model, 2, dtype=jnp.float32)
                           * (-math.log(10000.0) / d_model))                      # (d_model//2,)
        pe = jnp.zeros((max_len, d_model), dtype=jnp.float32)
        pe = pe.at[:, 0::2].set(jnp.sin(position * div_term))
        pe = pe.at[:, 1::2].set(jnp.cos(position * div_term))
        self.pe = pe   # kept in f32 (like the PyTorch buffer); cast per call if needed

    def _pe_arg(self, pe, S, tS):
        # pe block (tS, D): tS must be a multiple of 8 OR the block must equal the full
        # array dims. Slice only in the tiny-S fallback (tS == S, S % 8 != 0).
        if tS == S and S % 8 != 0 and S != self.max_len:
            return pe[:S]
        return pe

    def __call__(self, x):
        S, B, D = x.shape
        assert D == self.d_model
        if not (S < self.max_len):
            print("The length of the sequence is bigger than the max_len of the "
                  "positional encoding. Increase the max_len or provide a shorter sequence.")
        assert S <= self.max_len  # pe[:S] must exist

        pe = self.pe if self.pe.dtype == x.dtype else self.pe.astype(x.dtype)
        itemsize = jnp.dtype(x.dtype).itemsize

        # Small / ragged batch: fuse B into the lane axis so vregs and stores are dense.
        use_fused = (B < 8) or (B % 8 != 0 and B <= 64)

        if use_fused:
            N = B * D
            row_bytes = N * itemsize
            tS = _pick_seq_tile(S, row_bytes)
            pe_arg = self._pe_arg(pe, S, tS)
            n_s = pl.cdiv(S, tS)
            kernel = functools.partial(_add_pe_fused_kernel, n_batch=B, d_model=D)
            grid = (n_s,)
            in_specs = [
                pl.BlockSpec((tS, N), lambda i: (i, 0)),      # x (batch fused into lanes)
                pl.BlockSpec((tS, D), lambda i: (i, 0)),      # pe rows
            ]
            out_specs = pl.BlockSpec((tS, N), lambda i: (i, 0))
            out_shape = jax.ShapeDtypeStruct((S, N), x.dtype)
            semantics = ("parallel",)
            x_block_bytes = tS * N * itemsize
            pe_block_bytes = tS * D * itemsize
            operands = (x.reshape(S, N), pe_arg)              # free reshape (row-major)
        else:
            # B already a multiple of 8 (sublane-dense) or very large: 3-D tiles with a
            # (seq, batch) grid so huge B*D rows never exceed the VMEM budget.
            row_bytes = D * itemsize
            tB = B
            if 8 * B * row_bytes > _TARGET_BLOCK_BYTES:
                tB = max(8, _round_down8(_TARGET_BLOCK_BYTES // (8 * row_bytes)))
            tS = max(1, _TARGET_BLOCK_BYTES // (tB * row_bytes))
            if tS < S:
                tS = max(8, _round_down8(tS))
            tS = min(tS, S)
            n_s, n_b = pl.cdiv(S, tS), pl.cdiv(B, tB)
            if n_s * n_b == 1 and S > 8:                      # v7x megacore balance
                tS = max(8, _round_up8(-(-S // 2)))
                n_s = pl.cdiv(S, tS)
            pe_arg = self._pe_arg(pe, S, tS)
            kernel = _add_pe_3d_kernel
            grid = (n_s, n_b)
            in_specs = [
                pl.BlockSpec((tS, tB, D), lambda i, j: (i, j, 0)),
                pl.BlockSpec((tS, D), lambda i, j: (i, 0)),
            ]
            out_specs = pl.BlockSpec((tS, tB, D), lambda i, j: (i, j, 0))
            out_shape = jax.ShapeDtypeStruct((S, B, D), x.dtype)
            semantics = ("parallel", "parallel")
            x_block_bytes = tS * tB * D * itemsize
            pe_block_bytes = tS * D * itemsize
            operands = (x, pe_arg)

        # Double-buffered in + out blocks plus the (small) pe blocks, with slack.
        vmem_needed = 4 * x_block_bytes + 2 * pe_block_bytes + (2 << 20)
        vmem_limit = int(min(max(vmem_needed, 32 << 20), 64 << 20))

        cost = pl.CostEstimate(
            flops=S * B * D,
            transcendentals=0,
            bytes_accessed=2 * S * B * D * itemsize + S * D * itemsize,
        )

        # No input_output_aliases: without guaranteed donation XLA would insert a
        # defensive copy of x (extra HBM traffic) or risk clobbering a still-live x.
        out = pl.pallas_call(
            kernel,
            out_shape=out_shape,
            grid=grid,
            in_specs=in_specs,
            out_specs=out_specs,
            compiler_params=pltpu.CompilerParams(
                dimension_semantics=semantics,
                vmem_limit_bytes=vmem_limit,
            ),
            cost_estimate=cost,
        )(*operands)

        if use_fused:
            out = out.reshape(S, B, D)
        return out


if __name__ == "__main__":
    key = jax.random.PRNGKey(0)
    k1, k2 = jax.random.split(key)

    # Small-batch (lane-fused) path — matches the PyTorch module's seq-first layout.
    seq, batch, d_model = 8, 2, 32
    x = jax.random.normal(k1, (seq, batch, d_model), dtype=jnp.float32)
    module = PositionalEncodingPallas(d_model=d_model, dropout=0.0, max_len=5000)
    ref = x + module.pe[:seq][:, None, :]
    out = jax.block_until_ready(module(x))
    assert out.shape == (seq, batch, d_model)
    assert jnp.allclose(out, ref, atol=1e-6, rtol=1e-6)

    # Sublane-dense batch (3-D) path.
    seq2, batch2, d_model2 = 16, 8, 128
    x2 = jax.random.normal(k2, (seq2, batch2, d_model2), dtype=jnp.float32)
    module2 = PositionalEncodingPallas(d_model=d_model2, dropout=0.0, max_len=64)
    ref2 = x2 + module2.pe[:seq2][:, None, :]
    out2 = jax.block_until_ready(module2(x2))
    assert out2.shape == (seq2, batch2, d_model2)
    assert jnp.allclose(out2, ref2, atol=1e-6, rtol=1e-6)

    print("KERNEL_OK")
</pallas_src>

<mosaic_0001>
module attributes {stable_mosaic.version = 11 : i64} {
  func.func @_add_pe_fused_kernel(%arg0: i32, %arg1: memref<8x64xf32, #tpu.memory_space<vmem>>, %arg2: memref<8x32xf32, #tpu.memory_space<vmem>>, %arg3: memref<8x64xf32, #tpu.memory_space<vmem>>) attributes {dimension_semantics = [#tpu.dimension_semantics<parallel>], iteration_bounds = array<i64: 1>, scalar_prefetch = 0 : i64, scratch_operands = 0 : i64, tpu.core_type = #tpu.core_type<tc>, window_params = [{transform_indices = @transform_0, window_bounds = array<i64: 8, 64>}, {transform_indices = @transform_1, window_bounds = array<i64: 8, 32>}, {transform_indices = @transform_2, window_bounds = array<i64: 8, 64>}]} {
    %c0 = arith.constant 0 : index
    %c0_0 = arith.constant 0 : index
    %0 = vector.load %arg2[%c0, %c0_0] : memref<8x32xf32, #tpu.memory_space<vmem>>, vector<8x32xf32>
    %c0_1 = arith.constant 0 : index
    %c0_2 = arith.constant 0 : index
    %1 = vector.load %arg1[%c0_1, %c0_2] : memref<8x64xf32, #tpu.memory_space<vmem>>, vector<8x32xf32>
    %2 = arith.addf %1, %0 : vector<8x32xf32>
    %c0_3 = arith.constant 0 : index
    %c0_4 = arith.constant 0 : index
    %3 = vector.load %arg3[%c0_3, %c0_4] : memref<8x64xf32, #tpu.memory_space<vmem>>, vector<8x32xf32>
    tpu.vector_store %arg3[%c0_3, %c0_4], %2 {strides = array<i32>} : memref<8x64xf32, #tpu.memory_space<vmem>>, vector<8x32xf32>,
    %c0_5 = arith.constant 0 : index
    %c32 = arith.constant 32 : index
    %4 = vector.load %arg1[%c0_5, %c32] : memref<8x64xf32, #tpu.memory_space<vmem>>, vector<8x32xf32>
    %5 = arith.addf %4, %0 : vector<8x32xf32>
    %c0_6 = arith.constant 0 : index
    %c32_7 = arith.constant 32 : index
    %6 = vector.load %arg3[%c0_6, %c32_7] : memref<8x64xf32, #tpu.memory_space<vmem>>, vector<8x32xf32>
    tpu.vector_store %arg3[%c0_6, %c32_7], %5 {strides = array<i32>} : memref<8x64xf32, #tpu.memory_space<vmem>>, vector<8x32xf32>,
    return
  }
  func.func @transform_0(%arg0: i32) -> (i32, i32) {
    %c0_i32 = arith.constant 0 : i32
    %c0_i32_0 = arith.constant 0 : i32
    return %arg0, %c0_i32 : i32, i32
  }
  func.func @transform_1(%arg0: i32) -> (i32, i32) {
    %c0_i32 = arith.constant 0 : i32
    %c0_i32_0 = arith.constant 0 : i32
    return %arg0, %c0_i32 : i32, i32
  }
  func.func @transform_2(%arg0: i32) -> (i32, i32) {
    %c0_i32 = arith.constant 0 : i32
    %c0_i32_0 = arith.constant 0 : i32
    return %arg0, %c0_i32 : i32, i32
  }
}

</mosaic_0001>

<bundles_post_ra>
// kernel: tpu_custom_call.1
= control target key start
LH: loop header
LB: loop body
LE: loop exit
PB: predicated region body
PF: predicated region fallthrough
CT: control target
= control target key end

     0   :  { %vm15_vm0 = vcmask 261120   ;;  %s100_s0 = inlined_call_operand.vmem [shape: f32[8,64], index: 0, kind: input, shape index: {}]   ;;  %s101_s1 = inlined_call_operand.vmem [shape: f32[5000,32], index: 1, kind: input, shape index: {}]   ;;  %s102_s2 = inlined_call_operand.hbm [shape: f32[8,64], index: 2, kind: output, shape index: {}]  }
   0x1   :  { %v12_v0 = vld [vmem:[%s101_s1] sm:$0xff] }
   0x2   :  { %v13_v1 = vld [vmem:[%s100_s0] sm:$0xff] }
   0x3   :  { %7 = vsyncpa [#allocation3], 0  ;;  %v14_v2 = vadd.f32 %v13_v1, %v12_v0  ;;  %s65_s13 = smov 32   ;;  %s66_s14 = smov [#allocation2]   ;;  %vm23_vm1 = vcmask 523520  }
   0x4   :  { %19 = vrot.lane.b32.xlu0 %v12_v0, %s65_s13  ;;  %s31_s15 = sshll.u32 %s66_s14, 4  ;;  %s32_s15 = int_to_ptr.vmem [resolvable:$true] %s31_s15 }
   0x5   :  { %16 = vst.msk [vmem:[#allocation2] sm:$0xff] %vm15_vm0, %v14_v2  ;;  %s41_s16 = scalar_lea.vmem %s32_s15, 128  ;;  %p46_p1 = scmp.lt.s32.totalorder %s32_s15, %s32_s15 }
   0x6   :  { %p42_p0 = scmp.ne.s32.totalorder %s32_s15, %s41_s16  ;;  %p47_p2 = scmp.lt.s32.totalorder %s41_s16, %s41_s16 }
   0x8   :  { %p48_p3 = por %p47_p2, %p46_p1 }
   0xa   :  { %p49_p4 = pnand %p48_p3, %p42_p0 }
  0x76   :  { %v20_v3 = vpop.permute.xlu0 %19 }
  0x77   :  { %v22_v4 = vadd.f32 %v20_v3, %v13_v1 }
  0x79   :  { %24 = vst.msk [vmem:[#allocation2] sm:$0xff] %vm23_vm1, %v22_v4 }
  0x7a   :  { %52 = shalt.err (!%p49_p4)
}
  0x7b   :  { %s53_s17 = scalar_lea.hbm %s102_s2, 128 }
  0x7c   :  { %p54_p5 = scmp.ne.s32.totalorder %s102_s2, %s53_s17  ;;  %p57_p6 = scmp.lt.u32.totalorder %s53_s17, %s102_s2 }
  0x7e   :  { %p59_p7 = pnand %p57_p6, %p54_p5 }
  0x80   :  { %62 = shalt.err (!%p59_p7)
}
  0x81   :  { %34 = dma.vmem_to_hbm [thread:$0]  %s32_s15, 128, %s102_s2, [#allocation3]  }
  0x82   :  { %63 = dma.done.wait [#allocation3], 128  }
  0x83   :  { %64 = vsyncadd [#allocation3], 4294967168 }
  0x84   :  { %38 = vsyncpa [#allocation3], 1 }

</bundles_post_ra>
